<compile_context>
chip_gen: v7x
topology: tpu7x:2x2x1
jax: 0.10.0
libtpu: 0.0.40
codegen_flags: <defaults>
</compile_context>

<pallas_src>
import numpy as np
import jax
import jax.numpy as jnp
from jax.experimental import pallas as pl
from jax.experimental.pallas import tpu as pltpu


def _round_up(x, m):
    return ((x + m - 1) // m) * m


# ---------------------------------------------------------------------------
# Separable trilinear upsample (align_corners=True)
# ---------------------------------------------------------------------------
def _interp_matrix(n_in, n_out):
    # Per-axis matrix of F.interpolate(..., mode='trilinear', align_corners=True).
    M = np.zeros((n_out, n_in), np.float32)
    for j in range(n_out):
        src = 0.0 if n_out == 1 else j * (n_in - 1) / (n_out - 1)
        i0 = min(int(np.floor(src)), n_in - 1)
        f = src - i0
        i1 = min(i0 + 1, n_in - 1)
        M[j, i0] += 1.0 - f
        M[j, i1] += f
    return M


def _rowmm_kernel(x_ref, m_ref, o_ref):
    # (BR, L) @ (L, Lo): interpolation along the last (lane) axis.
    o_ref[...] = jnp.dot(x_ref[...], m_ref[...],
                         preferred_element_type=jnp.float32)


def _apply_interp_last(x, mt, block_rows=512):
    """Apply interpolation matrix mt (L, Lo) along the last axis of x."""
    lead = x.shape[:-1]
    L = x.shape[-1]
    Lo = mt.shape[1]
    R = int(np.prod(lead))
    x2 = x.reshape(R, L)

    BR = min(block_rows, _round_up(R, 8))
    Rp = _round_up(R, BR)
    if Rp != R:
        x2 = jnp.pad(x2, ((0, Rp - R), (0, 0)))

    out = pl.pallas_call(
        _rowmm_kernel,
        out_shape=jax.ShapeDtypeStruct((Rp, Lo), jnp.float32),
        grid_spec=pltpu.PrefetchScalarGridSpec(
            num_scalar_prefetch=0,
            grid=(Rp // BR,),
            in_specs=[pl.BlockSpec((BR, L), lambda r: (r, 0)),
                      pl.BlockSpec((L, Lo), lambda r: (0, 0))],
            out_specs=pl.BlockSpec((BR, Lo), lambda r: (r, 0))),
        compiler_params=pltpu.CompilerParams(
            dimension_semantics=("parallel",)),
    )(x2, mt)
    return out[:R].reshape(*lead, Lo)


def trilinear_upsample_to_ndhwc(x_ncdhw, scale=(2, 2, 2)):
    """x: (N, C, D, H, W) NCDHW -> upsampled (N, Do, Ho, Wo, C) channels-last."""
    N, C, D, H, W = x_ncdhw.shape
    Do, Ho, Wo = D * scale[0], H * scale[1], W * scale[2]
    mtw = jnp.asarray(_interp_matrix(W, Wo).T)     # (W, Wo)
    mth = jnp.asarray(_interp_matrix(H, Ho).T)     # (H, Ho)
    mtd = jnp.asarray(_interp_matrix(D, Do).T)     # (D, Do)

    x = _apply_interp_last(x_ncdhw, mtw)           # (N, C, D, H, Wo)
    x = jnp.swapaxes(x, 3, 4)                      # (N, C, D, Wo, H)
    x = _apply_interp_last(x, mth)                 # (N, C, D, Wo, Ho)
    x = jnp.transpose(x, (0, 1, 3, 4, 2))          # (N, C, Wo, Ho, D)
    x = _apply_interp_last(x, mtd)                 # (N, C, Wo, Ho, Do)
    return jnp.transpose(x, (0, 4, 3, 2, 1))       # (N, Do, Ho, Wo, C)


# ---------------------------------------------------------------------------
# Fused SEBasicBlock:
#   out = SE(conv2(relu(bn2(conv1(relu(bn1(x))))))) + conv1x1(relu(bn_sc(x)))
# ---------------------------------------------------------------------------
def se_basic_block(x, params, block_d=4):
    """x: (N, D, H, W, Cin) channels-last. Returns (N, D, H, W, P) f32."""
    N, D, H, W, Cin = x.shape
    P = params['w_sc'].shape[-1]
    mid = params['se_w1'].shape[-1]

    BS = int(min(block_d, D))                 # D-slab size
    nD = pl.cdiv(D, BS)
    Dpad = nD * BS
    L1 = BS + 4                               # input planes per slab (2-halo)
    L2 = BS + 2                               # conv1 output planes (1-halo)
    C3 = 3 * Cin
    P3 = 3 * P

    # D-pad with zeros: 2 in front, (Dpad - D + 2) behind; merge (N, D') rows so the
    # halo'd slab is a single dynamic slice along dim 0 for the manual DMA.
    xp = jnp.pad(x, ((0, 0), (2, Dpad - D + 2), (0, 0), (0, 0), (0, 0)))
    xp = xp.reshape(N * (Dpad + 4), H, W, Cin)

    prm = [params[k] for k in ('bn1_s', 'bn1_b', 'w1', 'bn2_s', 'bn2_b', 'w2',
                               'bnsc_s', 'bnsc_b', 'w_sc')]

    def full_spec(a):
        nd = a.ndim
        return pl.BlockSpec(a.shape, lambda n, i, _nd=nd: (0,) * _nd)

    slab_spec = pl.BlockSpec((1, BS, H, W, P), lambda n, i: (n, i, 0, 0, 0))

    # ------------------- kernel A: conv chain + shortcut -------------------
    def conv_chain_kernel(xp_hbm, bn1s, bn1b, w1r, bn2s, bn2b, w2r,
                          bnscs, bnscb, wsc,
                          y_ref, sc_ref,
                          xbuf, s1, acc1, s2, acc2, sem):
        n = pl.program_id(0)
        i = pl.program_id(1)

        # Fetch the halo'd x slab: global D planes [i*BS - 2, i*BS + BS + 2).
        row0 = n * (Dpad + 4) + i * BS
        cp = pltpu.make_async_copy(xp_hbm.at[pl.ds(row0, L1)], xbuf, sem.at[0])
        cp.start()
        cp.wait()
        # TODO(synk): double-buffer this DMA (prefetch slab i+1) to hide its latency.

        xv = xbuf[...]                                           # (L1,H,W,Cin) f32

        # bn1 + relu; zero out-of-volume D planes (== conv1's zero padding).
        d1 = jax.lax.broadcasted_iota(jnp.int32, (L1, 1, 1, 1), 0)
        g1 = i * BS - 2 + d1
        m1 = ((g1 >= 0) & (g1 < D)).astype(jnp.float32)
        a1 = jnp.maximum(xv * bn1s[...] + bn1b[...], 0.0) * m1   # (L1,H,W,Cin)

        # W-im2col scratch: S1[l, hh, w, kw*Cin + c] = a1_padHW[l, hh, w+kw, c].
        # Only halo rows / edge columns are zeroed (no full-scratch zeroing).
        zc = jnp.zeros((L1, H, 1, Cin), jnp.float32)
        s1[:, 0:1, :, :] = jnp.zeros((L1, 1, W, C3), jnp.float32)
        s1[:, H + 1:H + 2, :, :] = jnp.zeros((L1, 1, W, C3), jnp.float32)
        s1[:, 1:H + 1, 1:W, 0:Cin] = a1[:, :, 0:W - 1, :]
        s1[:, 1:H + 1, 0:1, 0:Cin] = zc
        s1[:, 1:H + 1, :, Cin:2 * Cin] = a1
        s1[:, 1:H + 1, 0:W - 1, 2 * Cin:C3] = a1[:, :, 1:W, :]
        s1[:, 1:H + 1, W - 1:W, 2 * Cin:C3] = zc

        # conv1: 9 dots, K = 3*Cin (kw folded into the contraction), bf16 MXU.
        step = 0
        for kd in range(3):
            for kh in range(3):
                win = s1[kd:kd + L2, kh:kh + H, :, :].reshape(L2 * H * W, C3)
                contrib = jnp.dot(win.astype(jnp.bfloat16), w1r[kd, kh],
                                  preferred_element_type=jnp.float32)
                if step == 0:
                    acc1[...] = contrib
                else:
                    acc1[...] += contrib
                step += 1

        # bn2 + relu; zero out-of-volume conv1 planes (== conv2's zero padding).
        c1 = acc1[...].reshape(L2, H, W, P)
        d2 = jax.lax.broadcasted_iota(jnp.int32, (L2, 1, 1, 1), 0)
        g2 = i * BS - 1 + d2
        m2 = ((g2 >= 0) & (g2 < D)).astype(jnp.float32)
        a2 = jnp.maximum(c1 * bn2s[...] + bn2b[...], 0.0) * m2   # (L2,H,W,P)

        zp = jnp.zeros((L2, H, 1, P), jnp.float32)
        s2[:, 0:1, :, :] = jnp.zeros((L2, 1, W, P3), jnp.float32)
        s2[:, H + 1:H + 2, :, :] = jnp.zeros((L2, 1, W, P3), jnp.float32)
        s2[:, 1:H + 1, 1:W, 0:P] = a2[:, :, 0:W - 1, :]
        s2[:, 1:H + 1, 0:1, 0:P] = zp
        s2[:, 1:H + 1, :, P:2 * P] = a2
        s2[:, 1:H + 1, 0:W - 1, 2 * P:P3] = a2[:, :, 1:W, :]
        s2[:, 1:H + 1, W - 1:W, 2 * P:P3] = zp

        # conv2: 9 dots, K = 3*P.
        step = 0
        for kd in range(3):
            for kh in range(3):
                win = s2[kd:kd + BS, kh:kh + H, :, :].reshape(BS * H * W, P3)
                contrib = jnp.dot(win.astype(jnp.bfloat16), w2r[kd, kh],
                                  preferred_element_type=jnp.float32)
                if step == 0:
                    acc2[...] = contrib
                else:
                    acc2[...] += contrib
                step += 1

        y_ref[0] = acc2[...].reshape(BS, H, W, P)                # pre-SE conv2 out

        # Shortcut: bn + relu + 1x1 conv on the (un-halo'd) x planes of this slab.
        xin = xbuf[2:2 + BS]                                     # (BS,H,W,Cin)
        rs = jnp.maximum(xin * bnscs[...] + bnscb[...], 0.0)
        sc = jnp.dot(rs.reshape(BS * H * W, Cin).astype(jnp.bfloat16), wsc[...],
                     preferred_element_type=jnp.float32)
        sc_ref[0] = sc.reshape(BS, H, W, P)

    scratch = [
        pltpu.VMEM((L1, H, W, Cin), jnp.float32),       # halo'd x slab
        pltpu.VMEM((L1, H + 2, W, C3), jnp.float32),    # W-im2col for conv1
        pltpu.VMEM((L2 * H * W, P), jnp.float32),       # conv1 accumulator
        pltpu.VMEM((L2, H + 2, W, P3), jnp.float32),    # W-im2col for conv2
        pltpu.VMEM((BS * H * W, P), jnp.float32),       # conv2 accumulator
        pltpu.SemaphoreType.DMA((1,)),
    ]

    # Explicit (generous) scoped-VMEM budget computed from the tile footprint.
    vmem_need = 4 * (L1 * H * W * Cin + L1 * (H + 2) * W * C3
                     + L2 * H * W * P + L2 * (H + 2) * W * P3
                     + BS * H * W * P + 4 * BS * H * W * P)
    vmem_need += sum(int(a.size) * a.dtype.itemsize for a in prm)
    vmem_limit = int(min(max(4 * vmem_need, 32 * 1024 * 1024), 100 * 1024 * 1024))

    y, sc = pl.pallas_call(
        conv_chain_kernel,
        out_shape=(jax.ShapeDtypeStruct((N, Dpad, H, W, P), jnp.float32),
                   jax.ShapeDtypeStruct((N, Dpad, H, W, P), jnp.float32)),
        grid_spec=pltpu.PrefetchScalarGridSpec(
            num_scalar_prefetch=0,
            grid=(N, nD),
            in_specs=[pl.BlockSpec(memory_space=pl.ANY)] + [full_spec(a) for a in prm],
            out_specs=(slab_spec, slab_spec),
            scratch_shapes=scratch),
        compiler_params=pltpu.CompilerParams(
            dimension_semantics=("parallel", "parallel"),
            vmem_limit_bytes=vmem_limit),
    )(xp, *prm)

    # Global average pool for the SE layer (glue; tiny reduction over valid planes).
    pooled = jnp.mean(y[:, :D], axis=(1, 2, 3))                  # (N, P)

    # ------------------- kernel B: SE gate + residual add -------------------
    def se_apply_kernel(pooled_ref, sw1, sb1, sw2, sb2, y_ref, sc_ref, o_ref):
        n = pl.program_id(0)
        pool = pooled_ref[pl.ds(n, 1), :]                        # (1, P)
        h = jnp.maximum(jnp.dot(pool, sw1[...],
                                preferred_element_type=jnp.float32) + sb1[...], 0.0)
        gate = jax.nn.sigmoid(jnp.dot(h, sw2[...],
                                      preferred_element_type=jnp.float32) + sb2[...])
        o_ref[0] = y_ref[0] * gate.reshape(1, 1, 1, P) + sc_ref[0]

    se_in = [pooled, params['se_w1'], params['se_b1'],
             params['se_w2'], params['se_b2']]
    out = pl.pallas_call(
        se_apply_kernel,
        out_shape=jax.ShapeDtypeStruct((N, Dpad, H, W, P), jnp.float32),
        grid_spec=pltpu.PrefetchScalarGridSpec(
            num_scalar_prefetch=0,
            grid=(N, nD),
            in_specs=[full_spec(a) for a in se_in] + [slab_spec, slab_spec],
            out_specs=slab_spec,
            scratch_shapes=[]),
        compiler_params=pltpu.CompilerParams(
            dimension_semantics=("parallel", "parallel")),
    )(*se_in, y, sc)

    return out[:, :D]


# ---------------------------------------------------------------------------
# Parameters (deterministic, synthetic); kernel-ready layouts.
# ---------------------------------------------------------------------------
def init_params(key, in_ch, out_ch, reduction=2):
    cin = in_ch + out_ch            # SEBasicBlock inplanes (concat channels)
    p = out_ch                      # planes
    mid = max(p // reduction, 1)    # SE bottleneck channels
    keys = jax.random.split(key, 10)

    def bn_fold(k, c):
        kg, kb, km, kv = jax.random.split(k, 4)
        gamma = jax.random.uniform(kg, (c,), jnp.float32, minval=0.5, maxval=1.5)
        beta = 0.1 * jax.random.normal(kb, (c,), jnp.float32)
        mean = 0.1 * jax.random.normal(km, (c,), jnp.float32)
        var = jax.random.uniform(kv, (c,), jnp.float32, minval=0.5, maxval=1.5)
        scale = gamma / jnp.sqrt(var + 1e-5)
        bias = beta - mean * scale
        return scale.reshape(1, 1, 1, c), bias.reshape(1, 1, 1, c)

    def conv_w(k, ci, co):
        # (kd, kh, kw, ci, co) -> (kd, kh, kw*ci, co) bf16; row order kw*ci + c
        # matches the W-im2col lane layout used in the kernel.
        w = jax.random.normal(k, (3, 3, 3, ci, co), jnp.float32) / np.sqrt(27 * ci)
        return w.reshape(3, 3, 3 * ci, co).astype(jnp.bfloat16)

    bn1_s, bn1_b = bn_fold(keys[0], cin)
    bn2_s, bn2_b = bn_fold(keys[1], p)
    bnsc_s, bnsc_b = bn_fold(keys[2], cin)

    return dict(
        bn1_s=bn1_s, bn1_b=bn1_b,
        w1=conv_w(keys[3], cin, p),
        bn2_s=bn2_s, bn2_b=bn2_b,
        w2=conv_w(keys[4], p, p),
        se_w1=jax.random.normal(keys[5], (p, mid), jnp.float32) / np.sqrt(p),
        se_b1=0.1 * jax.random.normal(keys[6], (1, mid), jnp.float32),
        se_w2=jax.random.normal(keys[7], (mid, p), jnp.float32) / np.sqrt(mid),
        se_b2=0.1 * jax.random.normal(keys[8], (1, p), jnp.float32),
        bnsc_s=bnsc_s, bnsc_b=bnsc_b,
        w_sc=(jax.random.normal(keys[9], (cin, p), jnp.float32)
              / np.sqrt(cin)).astype(jnp.bfloat16),
    )


# ---------------------------------------------------------------------------
# Wrapper: up_block forward (NCDHW in / NCDHW out)
# ---------------------------------------------------------------------------
def up_block_forward(x1, x2, params, scale=(2, 2, 2), block_d=4):
    """x1: (N, in_ch, D1, H1, W1), x2: (N, out_ch, D, H, W). Returns NCDHW."""
    x1_up = trilinear_upsample_to_ndhwc(x1, scale)       # (N, D, H, W, in_ch)
    x2_cl = jnp.transpose(x2, (0, 2, 3, 4, 1))           # (N, D, H, W, out_ch)
    # torch.cat([x2, x1], dim=1)  -> channels-last concat [x2 | x1_up].
    # TODO(synk): pass x2_cl / x1_up separately with split conv1/shortcut weight
    #             row-blocks to avoid materializing the concatenation in HBM.
    x = jnp.concatenate([x2_cl, x1_up], axis=-1)
    out_cl = se_basic_block(x, params, block_d=block_d)  # (N, D, H, W, out_ch)
    return jnp.transpose(out_cl, (0, 4, 1, 2, 3))


if __name__ == "__main__":
    key = jax.random.PRNGKey(0)
    k1, k2, kp = jax.random.split(key, 3)

    N, in_ch, out_ch = 2, 8, 8
    D1 = H1 = W1 = 4

    x1 = jax.random.normal(k1, (N, in_ch, D1, H1, W1), jnp.float32)
    x2 = jax.random.normal(k2, (N, out_ch, 2 * D1, 2 * H1, 2 * W1), jnp.float32)

    params = init_params(kp, in_ch, out_ch, reduction=2)

    out = up_block_forward(x1, x2, params, scale=(2, 2, 2), block_d=4)
    out = jax.block_until_ready(out)

    assert out.shape == (N, out_ch, 2 * D1, 2 * H1, 2 * W1), out.shape
    assert bool(jnp.all(jnp.isfinite(out)))
    print("KERNEL_OK")
</pallas_src>

<mosaic_0001>
module attributes {stable_mosaic.version = 11 : i64} {
  func.func @_rowmm_kernel(%arg0: i32, %arg1: memref<256x4xf32, #tpu.memory_space<vmem>>, %arg2: memref<4x8xf32, #tpu.memory_space<vmem>>, %arg3: memref<256x8xf32, #tpu.memory_space<vmem>>) attributes {dimension_semantics = [#tpu.dimension_semantics<parallel>], iteration_bounds = array<i64: 1>, scalar_prefetch = 0 : i64, scratch_operands = 0 : i64, tpu.core_type = #tpu.core_type<tc>, window_params = [{transform_indices = @transform_0, window_bounds = array<i64: 256, 4>}, {pipeline_mode = #tpu.pipeline_mode<synchronous>, transform_indices = @transform_1, window_bounds = array<i64: 4, 8>}, {transform_indices = @transform_2, window_bounds = array<i64: 256, 8>}]} {
    %c0 = arith.constant 0 : index
    %c0_0 = arith.constant 0 : index
    %0 = vector.load %arg1[%c0, %c0_0] : memref<256x4xf32, #tpu.memory_space<vmem>>, vector<256x4xf32>
    %c0_1 = arith.constant 0 : index
    %c0_2 = arith.constant 0 : index
    %1 = vector.load %arg2[%c0_1, %c0_2] : memref<4x8xf32, #tpu.memory_space<vmem>>, vector<4x8xf32>
    %cst = arith.constant dense<0.000000e+00> : vector<256x8xf32>
    %2 = tpu.matmul %0, %1, %cst {dimension_numbers = #tpu.dot_dimension_numbers<[1], [0], [0], [1], [0, 0, 1, 1], [], []>} : vector<256x4xf32>, vector<4x8xf32>, vector<256x8xf32> -> vector<256x8xf32>
    %c0_3 = arith.constant 0 : index
    %c0_4 = arith.constant 0 : index
    %3 = vector.load %arg3[%c0_3, %c0_4] : memref<256x8xf32, #tpu.memory_space<vmem>>, vector<256x8xf32>
    tpu.vector_store %arg3[%c0_3, %c0_4], %2 {strides = array<i32>} : memref<256x8xf32, #tpu.memory_space<vmem>>, vector<256x8xf32>,
    return
  }
  func.func @transform_0(%arg0: i32) -> (i32, i32) {
    %c0_i32 = arith.constant 0 : i32
    %c0_i32_0 = arith.constant 0 : i32
    return %arg0, %c0_i32 : i32, i32
  }
  func.func @transform_1(%arg0: i32) -> (i32, i32) {
    %c0_i32 = arith.constant 0 : i32
    %c0_i32_0 = arith.constant 0 : i32
    %c0_i32_1 = arith.constant 0 : i32
    return %c0_i32, %c0_i32_0 : i32, i32
  }
  func.func @transform_2(%arg0: i32) -> (i32, i32) {
    %c0_i32 = arith.constant 0 : i32
    %c0_i32_0 = arith.constant 0 : i32
    return %arg0, %c0_i32 : i32, i32
  }
}

</mosaic_0001>

<bundles_post_ra>
// kernel: tpu_custom_call.1
= control target key start
LH: loop header
LB: loop body
LE: loop exit
PB: predicated region body
PF: predicated region fallthrough
CT: control target
= control target key end

     0   :  { %vm141_vm0 = vcmask 1043456   ;;  %vm44_vm1 = vcmask 31744   ;;  %vm370_vm2 = vcmask 64512   ;;  %s799_s1 = inlined_call_operand.vmem [shape: f32[4,8], index: 1, kind: input, shape index: {}]   ;;  %s800_s0 = inlined_call_operand.vmem [shape: f32[256,4], index: 0, kind: input, shape index: {}]   ;;  %s801_s2 = inlined_call_operand.vmem [shape: f32[256,8], index: 2, kind: output, shape index: {}]  }
   0x1   :  { %v43_v0 = vld [vmem:[%s799_s1] sm:$0xf]  ;;  %v12_v3 = vld [vmem:[%s800_s0 + $0x8] sm:$0xff]  ;;  %v13_v5 = vld [vmem:[%s800_s0 + $0x10] sm:$0xff] }
   0x2   :  { %v11_v1 = vld [vmem:[%s800_s0] sm:$0xff]  ;;  %473 = vmatprep.subr.msk.mxu0 %vm141_vm0, %v43_v0  ;;  %523 = vmatprep.subr.msk.mxu1 %vm141_vm0, %v43_v0  ;;  %v28_v4 = vld [vmem:[%s800_s0 + $0x88] sm:$0xff]  ;;  %v29_v6 = vld [vmem:[%s800_s0 + $0x90] sm:$0xff] }
   0x3   :  { %v27_v2 = vld [vmem:[%s800_s0 + $0x80] sm:$0xff]  ;;  %474 = vmatpush3.msk.msra.mxu0 %vm141_vm0, %v43_v0  ;;  %524 = vmatpush3.msk.msra.mxu1 %vm141_vm0, %v43_v0  ;;  %v14_v7 = vld [vmem:[%s800_s0 + $0x18] sm:$0xff]  ;;  %v16_v11 = vld [vmem:[%s800_s0 + $0x28] sm:$0xff] }
   0x4   :  { %475 = vmatprep.mubr.msk.f32.mxu0 %vm44_vm1, %v11_v1  ;;  %499 = vmatprep.mubr.msk.f32.mxu1 %vm44_vm1, %v27_v2  ;;  %v30_v8 = vld [vmem:[%s800_s0 + $0x98] sm:$0xff]  ;;  %v15_v9 = vld [vmem:[%s800_s0 + $0x20] sm:$0xff]  ;;  %v32_v12 = vld [vmem:[%s800_s0 + $0xa8] sm:$0xff] }
   0x5   :  { %476 = vmatmul.mubr.msk.f32.vlgmr.msra.gmra.mrb[0].mxu0 %vm44_vm1, %v12_v3  ;;  %500 = vmatmul.mubr.msk.f32.vlgmr.msra.gmra.mrb[0].mxu1 %vm44_vm1, %v28_v4  ;;  %v31_v10 = vld [vmem:[%s800_s0 + $0xa0] sm:$0xff]  ;;  %v17_v13 = vld [vmem:[%s800_s0 + $0x30] sm:$0xff]  ;;  %v18_v15 = vld [vmem:[%s800_s0 + $0x38] sm:$0xff] }
   0x6   :  { %478 = vmatprep.mubr.msk.f32.mxu0 %vm44_vm1, %v13_v5  ;;  %502 = vmatprep.mubr.msk.f32.mxu1 %vm44_vm1, %v29_v6  ;;  %v33_v14 = vld [vmem:[%s800_s0 + $0xb0] sm:$0xff]  ;;  %v34_v16 = vld [vmem:[%s800_s0 + $0xb8] sm:$0xff]  ;;  %v19_v17 = vld [vmem:[%s800_s0 + $0x40] sm:$0xff] }
   0x7   :  { %v35_v18 = vld [vmem:[%s800_s0 + $0xc0] sm:$0xff]  ;;  %v20_v19 = vld [vmem:[%s800_s0 + $0x48] sm:$0xff]  ;;  %v21_v21 = vld [vmem:[%s800_s0 + $0x50] sm:$0xff] }
   0x8   :  { %v36_v20 = vld [vmem:[%s800_s0 + $0xc8] sm:$0xff]  ;;  %v37_v22 = vld [vmem:[%s800_s0 + $0xd0] sm:$0xff]  ;;  %v22_v23 = vld [vmem:[%s800_s0 + $0x58] sm:$0xff] }
   0x9   :  { %479 = vmatmul.mubr.msk.f32.gmra.mrb[2].mxu0 %vm44_vm1, %v14_v7  ;;  %503 = vmatmul.mubr.msk.f32.gmra.mrb[2].mxu1 %vm44_vm1, %v30_v8  ;;  %v38_v24 = vld [vmem:[%s800_s0 + $0xd8] sm:$0xff]  ;;  %v23_v25 = vld [vmem:[%s800_s0 + $0x60] sm:$0xff]  ;;  %v24_v27 = vld [vmem:[%s800_s0 + $0x68] sm:$0xff] }
   0xa   :  { %481 = vmatprep.mubr.msk.f32.mxu0 %vm44_vm1, %v15_v9  ;;  %505 = vmatprep.mubr.msk.f32.mxu1 %vm44_vm1, %v31_v10  ;;  %v39_v26 = vld [vmem:[%s800_s0 + $0xe0] sm:$0xff]  ;;  %v40_v28 = vld [vmem:[%s800_s0 + $0xe8] sm:$0xff]  ;;  %v25_v29 = vld [vmem:[%s800_s0 + $0x70] sm:$0xff] }
   0xb   :  { %v41_v30 = vld [vmem:[%s800_s0 + $0xf0] sm:$0xff]  ;;  %v26_v31 = vld [vmem:[%s800_s0 + $0x78] sm:$0xff] }
   0xc   :  { %v42_v32 = vld [vmem:[%s800_s0 + $0xf8] sm:$0xff] }
   0xd   :  { %482 = vmatmul.mubr.msk.f32.gmra.mrb[4].mxu0 %vm44_vm1, %v16_v11  ;;  %506 = vmatmul.mubr.msk.f32.gmra.mrb[4].mxu1 %vm44_vm1, %v32_v12 }
   0xe   :  { %484 = vmatprep.mubr.msk.f32.mxu0 %vm44_vm1, %v17_v13  ;;  %508 = vmatprep.mubr.msk.f32.mxu1 %vm44_vm1, %v33_v14 }
  0x11   :  { %485 = vmatmul.mubr.msk.f32.gmra.mrb[6].mxu0 %vm44_vm1, %v18_v15  ;;  %509 = vmatmul.mubr.msk.f32.gmra.mrb[6].mxu1 %vm44_vm1, %v34_v16 }
  0x12   :  { %487 = vmatprep.mubr.msk.f32.mxu0 %vm44_vm1, %v19_v17  ;;  %511 = vmatprep.mubr.msk.f32.mxu1 %vm44_vm1, %v35_v18 }
  0x15   :  { %488 = vmatmul.mubr.msk.f32.gmra.mrb[8].mxu0 %vm44_vm1, %v20_v19  ;;  %512 = vmatmul.mubr.msk.f32.gmra.mrb[8].mxu1 %vm44_vm1, %v36_v20 }
  0x16   :  { %490 = vmatprep.mubr.msk.f32.mxu0 %vm44_vm1, %v21_v21  ;;  %514 = vmatprep.mubr.msk.f32.mxu1 %vm44_vm1, %v37_v22 }
  0x19   :  { %491 = vmatmul.mubr.msk.f32.gmra.mrb[10].mxu0 %vm44_vm1, %v22_v23  ;;  %515 = vmatmul.mubr.msk.f32.gmra.mrb[10].mxu1 %vm44_vm1, %v38_v24 }
  0x1a   :  { %493 = vmatprep.mubr.msk.f32.mxu0 %vm44_vm1, %v23_v25  ;;  %517 = vmatprep.mubr.msk.f32.mxu1 %vm44_vm1, %v39_v26 }
  0x1d   :  { %494 = vmatmul.mubr.msk.f32.gmra.mrb[12].mxu0 %vm44_vm1, %v24_v27  ;;  %518 = vmatmul.mubr.msk.f32.gmra.mrb[12].mxu1 %vm44_vm1, %v40_v28 }
  0x1e   :  { %496 = vmatprep.mubr.msk.f32.mxu0 %vm44_vm1, %v25_v29  ;;  %520 = vmatprep.mubr.msk.f32.mxu1 %vm44_vm1, %v41_v30 }
  0x21   :  { %497 = vmatmul.mubr.msk.f32.gmra.mrb[14].mxu0 %vm44_vm1, %v26_v31  ;;  %521 = vmatmul.mubr.msk.f32.gmra.mrb[14].mxu1 %vm44_vm1, %v42_v32 }
  0xd8   :  { %v477_v33 = vpop.f32.mrb[0].mxu0  ;;  %v501_v34 = vpop.f32.mrb[0].mxu1 }
  0xd9   :  { %372 = vst.msk [vmem:[%s801_s2 + $0x8] sm:$0xff] %vm370_vm2, %v477_v33  ;;  %388 = vst.msk [vmem:[%s801_s2 + $0x88] sm:$0xff] %vm370_vm2, %v501_v34  ;;  %v211_v35 = vpop.f32.mrb[1].mxu0  ;;  %v291_v36 = vpop.f32.mrb[1].mxu1 }
  0xda   :  { %371 = vst.msk [vmem:[%s801_s2] sm:$0xff] %vm370_vm2, %v211_v35  ;;  %387 = vst.msk [vmem:[%s801_s2 + $0x80] sm:$0xff] %vm370_vm2, %v291_v36 }
  0xdc   :  { %v480_v37 = vpop.f32.mrb[2].mxu0  ;;  %v504_v38 = vpop.f32.mrb[2].mxu1 }
  0xdd   :  { %374 = vst.msk [vmem:[%s801_s2 + $0x18] sm:$0xff] %vm370_vm2, %v480_v37  ;;  %390 = vst.msk [vmem:[%s801_s2 + $0x98] sm:$0xff] %vm370_vm2, %v504_v38  ;;  %v221_v39 = vpop.f32.mrb[3].mxu0  ;;  %v301_v40 = vpop.f32.mrb[3].mxu1 }
  0xde   :  { %373 = vst.msk [vmem:[%s801_s2 + $0x10] sm:$0xff] %vm370_vm2, %v221_v39  ;;  %389 = vst.msk [vmem:[%s801_s2 + $0x90] sm:$0xff] %vm370_vm2, %v301_v40 }
  0xe0   :  { %v483_v41 = vpop.f32.mrb[4].mxu0  ;;  %v507_v42 = vpop.f32.mrb[4].mxu1 }
  0xe1   :  { %376 = vst.msk [vmem:[%s801_s2 + $0x28] sm:$0xff] %vm370_vm2, %v483_v41  ;;  %392 = vst.msk [vmem:[%s801_s2 + $0xa8] sm:$0xff] %vm370_vm2, %v507_v42  ;;  %v231_v43 = vpop.f32.mrb[5].mxu0  ;;  %v311_v44 = vpop.f32.mrb[5].mxu1 }
  0xe2   :  { %375 = vst.msk [vmem:[%s801_s2 + $0x20] sm:$0xff] %vm370_vm2, %v231_v43  ;;  %391 = vst.msk [vmem:[%s801_s2 + $0xa0] sm:$0xff] %vm370_vm2, %v311_v44 }
  0xe4   :  { %v486_v45 = vpop.f32.mrb[6].mxu0  ;;  %v510_v46 = vpop.f32.mrb[6].mxu1 }
  0xe5   :  { %378 = vst.msk [vmem:[%s801_s2 + $0x38] sm:$0xff] %vm370_vm2, %v486_v45  ;;  %394 = vst.msk [vmem:[%s801_s2 + $0xb8] sm:$0xff] %vm370_vm2, %v510_v46  ;;  %v241_v47 = vpop.f32.mrb[7].mxu0  ;;  %v321_v48 = vpop.f32.mrb[7].mxu1 }
  0xe6   :  { %377 = vst.msk [vmem:[%s801_s2 + $0x30] sm:$0xff] %vm370_vm2, %v241_v47  ;;  %393 = vst.msk [vmem:[%s801_s2 + $0xb0] sm:$0xff] %vm370_vm2, %v321_v48 }
  0xe8   :  { %v489_v49 = vpop.f32.mrb[8].mxu0  ;;  %v513_v50 = vpop.f32.mrb[8].mxu1 }
  0xe9   :  { %380 = vst.msk [vmem:[%s801_s2 + $0x48] sm:$0xff] %vm370_vm2, %v489_v49  ;;  %396 = vst.msk [vmem:[%s801_s2 + $0xc8] sm:$0xff] %vm370_vm2, %v513_v50  ;;  %v251_v51 = vpop.f32.mrb[9].mxu0  ;;  %v331_v52 = vpop.f32.mrb[9].mxu1 }
  0xea   :  { %379 = vst.msk [vmem:[%s801_s2 + $0x40] sm:$0xff] %vm370_vm2, %v251_v51  ;;  %395 = vst.msk [vmem:[%s801_s2 + $0xc0] sm:$0xff] %vm370_vm2, %v331_v52 }
  0xec   :  { %v492_v53 = vpop.f32.mrb[10].mxu0  ;;  %v516_v54 = vpop.f32.mrb[10].mxu1 }
  0xed   :  { %382 = vst.msk [vmem:[%s801_s2 + $0x58] sm:$0xff] %vm370_vm2, %v492_v53  ;;  %398 = vst.msk [vmem:[%s801_s2 + $0xd8] sm:$0xff] %vm370_vm2, %v516_v54  ;;  %v261_v55 = vpop.f32.mrb[11].mxu0  ;;  %v341_v56 = vpop.f32.mrb[11].mxu1 }
  0xee   :  { %381 = vst.msk [vmem:[%s801_s2 + $0x50] sm:$0xff] %vm370_vm2, %v261_v55  ;;  %397 = vst.msk [vmem:[%s801_s2 + $0xd0] sm:$0xff] %vm370_vm2, %v341_v56 }
  0xf0   :  { %v495_v57 = vpop.f32.mrb[12].mxu0  ;;  %v519_v58 = vpop.f32.mrb[12].mxu1 }
  0xf1   :  { %384 = vst.msk [vmem:[%s801_s2 + $0x68] sm:$0xff] %vm370_vm2, %v495_v57  ;;  %400 = vst.msk [vmem:[%s801_s2 + $0xe8] sm:$0xff] %vm370_vm2, %v519_v58  ;;  %v271_v59 = vpop.f32.mrb[13].mxu0  ;;  %v351_v60 = vpop.f32.mrb[13].mxu1 }
  0xf2   :  { %383 = vst.msk [vmem:[%s801_s2 + $0x60] sm:$0xff] %vm370_vm2, %v271_v59  ;;  %399 = vst.msk [vmem:[%s801_s2 + $0xe0] sm:$0xff] %vm370_vm2, %v351_v60 }
  0xf4   :  { %v498_v61 = vpop.f32.mrb[14].mxu0  ;;  %v522_v62 = vpop.f32.mrb[14].mxu1 }
  0xf5   :  { %386 = vst.msk [vmem:[%s801_s2 + $0x78] sm:$0xff] %vm370_vm2, %v498_v61  ;;  %402 = vst.msk [vmem:[%s801_s2 + $0xf8] sm:$0xff] %vm370_vm2, %v522_v62  ;;  %v281_v63 = vpop.f32.mrb[15].mxu0  ;;  %v361_v0 = vpop.f32.mrb[15].mxu1 }
  0xf6   :  { %385 = vst.msk [vmem:[%s801_s2 + $0x70] sm:$0xff] %vm370_vm2, %v281_v63  ;;  %401 = vst.msk [vmem:[%s801_s2 + $0xf0] sm:$0xff] %vm370_vm2, %v361_v0 }

</bundles_post_ra>
